<compile_context>
chip_gen: v5e
topology: v5e:2x2
jax: 0.10.0
libtpu: 0.0.40
codegen_flags: <defaults>
</compile_context>

<pallas_src>
import functools

import jax
import jax.numpy as jnp
from jax.experimental import pallas as pl
from jax.experimental.pallas import tpu as pltpu


def _round_up(n: int, m: int) -> int:
    return (n + m - 1) // m * m


def _fused_kernel(douts_ref, x_ref, w_ref, aux_ref, o_ref, h_ref, *,
                  eps, n_layers, in_pad, out_pad):
    """One grid step = the WHOLE layer stack applied to one batch tile.

    douts_ref : SMEM (L,) int32    real output width of each layer (scalar prefetch)
    x_ref     : VMEM (tb, in_pad)  padded input tile (f32)
    w_ref     : VMEM (L, P, P)     bf16 weight stack, resident (constant index_map)
    aux_ref   : VMEM (L, 4, P)     f32 [bias, gamma, beta, alpha] per layer, resident
    o_ref     : VMEM (tb, out_pad) output tile
    h_ref     : VMEM (tb, P)       f32 activation carried across layers
    """
    tb, P = h_ref.shape

    # Load this batch tile into the resident f32 activation, zero-extending lanes
    # beyond the real input width (padded lanes must be exactly 0 for the maskless
    # LayerNorm below to be correct).
    if in_pad == P:
        h_ref[...] = x_ref[...].astype(jnp.float32)
    else:
        h_ref[:, :in_pad] = x_ref[...].astype(jnp.float32)
        h_ref[:, in_pad:] = jnp.zeros((tb, P - in_pad), jnp.float32)

    def layer_body(l, carry):
        h = h_ref[...]                                   # (tb, P) f32
        w = w_ref[l]                                     # (P, P)  bf16, zero-padded
        aux = aux_ref[l]                                 # (4, P)  f32
        bias, gamma, beta, alpha = aux[0:1], aux[1:2], aux[2:3], aux[3:4]  # each (1, P)

        # Linear on the MXU: bf16 operands, f32 accumulate.  Padded rows of h and
        # padded rows/cols of w (and bias padding) are zero -> padded lanes of y == 0.
        y = jnp.dot(h.astype(jnp.bfloat16), w,
                    preferred_element_type=jnp.float32) + bias            # (tb, P)

        # LayerNorm over the REAL feature count d (biased variance, like
        # torch.nn.LayerNorm).  Maskless E[x^2]-mean^2 form: padded lanes of y are 0
        # so they contribute nothing to either sum, and gamma/beta zero-padding
        # re-zeroes the padded lanes of the normalized result.
        inv_d = 1.0 / douts_ref[l].astype(jnp.float32)
        mean = jnp.sum(y, axis=-1, keepdims=True) * inv_d
        var = jnp.sum(y * y, axis=-1, keepdims=True) * inv_d - mean * mean
        var = jnp.maximum(var, 0.0)                      # guard tiny negative cancellation
        y_norm = (y - mean) * jax.lax.rsqrt(var + eps) * gamma + beta

        # PReLU (torch default: one scalar alpha, broadcast over lanes at pack time).
        # Padded lanes of y_norm are exactly 0 and stay 0 through the where.
        h_ref[...] = jnp.where(y_norm > 0, y_norm, alpha * y_norm)
        return carry

    jax.lax.fori_loop(0, n_layers, layer_body, 0)

    # Only the last layer's (narrow) padded width goes back to HBM.
    o_ref[...] = h_ref[:, :out_pad].astype(o_ref.dtype)


def _pack_params(params, feat_pad):
    """Zero-pad each layer's params to the common lane-dense width and stack.

    Weights are stored as bf16 (MXU operands); bias/gamma/beta/alpha stay f32.
    """
    P = feat_pad
    ws, auxs, douts = [], [], []
    for (w, b, gamma, beta, alpha) in params:
        din, dout = w.shape
        w_p = jnp.zeros((P, P), jnp.float32).at[:din, :dout].set(w.astype(jnp.float32))
        ws.append(w_p.astype(jnp.bfloat16))
        aux = jnp.zeros((4, P), jnp.float32)
        aux = aux.at[0, :dout].set(b.astype(jnp.float32))
        aux = aux.at[1, :dout].set(gamma.astype(jnp.float32))
        aux = aux.at[2, :dout].set(beta.astype(jnp.float32))
        aux = aux.at[3, :].set(jnp.float32(alpha))       # scalar alpha -> all lanes
        auxs.append(aux)
        douts.append(dout)
    return jnp.stack(ws), jnp.stack(auxs), jnp.asarray(douts, jnp.int32)


def feed_forward_linear(x, params, *, eps=1e-5, batch_tile=512):
    """Run the whole FeedForwardLinear stack with a single fused pallas_call."""
    n_layers = len(params)
    din0 = params[0][0].shape[0]
    dout_last = params[-1][0].shape[1]
    batch = x.shape[0]

    # One common lane-dense feature width P for the resident activation/weights,
    # but narrower dedicated widths for the input DMA and the output store.
    real_dims = [din0] + [w.shape[1] for (w, *_r) in params]
    P = _round_up(max(real_dims), 128)
    in_pad = _round_up(din0, 128)
    out_pad = _round_up(dout_last, 128)

    w_stack, aux_stack, douts = _pack_params(params, P)

    # Batch tiling (f32 sublane = 8).  Prefer big tiles, but make sure small batches
    # still split into >= 2 tiles so the "parallel" axis can feed both v7x TCs.
    tb = min(batch_tile, _round_up(batch, 8))
    if batch > 8:
        tb = min(tb, _round_up((batch + 1) // 2, 8))
    batch_pad = _round_up(batch, tb)

    # Input padded only to its own lane-dense width (zero-extension to P happens
    # for free inside the kernel when it fills the VMEM activation).
    x_p = jnp.zeros((batch_pad, in_pad), jnp.float32).at[:batch, :din0].set(
        x.astype(jnp.float32))

    grid = (batch_pad // tb,)

    # Scoped VMEM budget: resident weight/aux stacks (+ double buffering that the
    # pipeline may allocate), double-buffered in/out tiles, and the f32 activation.
    weight_bytes = w_stack.size * w_stack.dtype.itemsize
    aux_bytes = aux_stack.size * aux_stack.dtype.itemsize
    io_bytes = tb * (in_pad + out_pad) * 4
    scratch_bytes = tb * P * 4
    vmem_bytes = 2 * (weight_bytes + aux_bytes + io_bytes) + scratch_bytes
    vmem_limit = int(min(max(vmem_bytes + (4 << 20), 32 << 20), 128 << 20))

    out = pl.pallas_call(
        functools.partial(_fused_kernel, eps=eps, n_layers=n_layers,
                          in_pad=in_pad, out_pad=out_pad),
        out_shape=jax.ShapeDtypeStruct((batch_pad, out_pad), jnp.float32),
        grid_spec=pltpu.PrefetchScalarGridSpec(
            num_scalar_prefetch=1,          # douts -> SMEM
            grid=grid,
            in_specs=[
                # x: one block per batch tile
                pl.BlockSpec((tb, in_pad), lambda i, douts: (i, 0)),
                # whole bf16 weight stack, resident (block index never changes)
                pl.BlockSpec((n_layers, P, P), lambda i, douts: (0, 0, 0)),
                # whole packed bias/gamma/beta/alpha stack, resident
                pl.BlockSpec((n_layers, 4, P), lambda i, douts: (0, 0, 0)),
            ],
            out_specs=pl.BlockSpec((tb, out_pad), lambda i, douts: (i, 0)),
            scratch_shapes=[pltpu.VMEM((tb, P), jnp.float32)],  # resident activation
        ),
        compiler_params=pltpu.CompilerParams(
            dimension_semantics=("parallel",),
            vmem_limit_bytes=vmem_limit,
        ),
    )(douts, x_p, w_stack, aux_stack)

    return out[:batch, :dout_last]


def init_params(key, dims):
    """Deterministic PyTorch-like init for each block."""
    params = []
    for din, dout in zip(dims, dims[1:]):
        key, kw, kb = jax.random.split(key, 3)
        bound = 1.0 / float(din) ** 0.5
        w = jax.random.uniform(kw, (din, dout), jnp.float32, -bound, bound)
        b = jax.random.uniform(kb, (dout,), jnp.float32, -bound, bound)
        gamma = jnp.ones((dout,), jnp.float32)          # LayerNorm weight
        beta = jnp.zeros((dout,), jnp.float32)          # LayerNorm bias
        alpha = jnp.float32(0.25)                       # PReLU scalar (torch default)
        params.append((w, b, gamma, beta, alpha))
    return params


def _reference(x, params, eps=1e-5):
    """Pure-JAX f32 reference for sanity checking."""
    for (w, b, gamma, beta, alpha) in params:
        y = x @ w + b
        mean = jnp.mean(y, axis=-1, keepdims=True)
        var = jnp.mean((y - mean) ** 2, axis=-1, keepdims=True)
        yn = (y - mean) / jnp.sqrt(var + eps) * gamma + beta
        x = jnp.where(yn > 0, yn, alpha * yn)
    return x


if __name__ == "__main__":
    # FeedForwardLinear(dims) -> blocks 48->160, 160->96, 96->24.
    # Chosen so the kernel exercises zero-extension (in_pad < P), the narrow output
    # path (out_pad < P), a multi-layer fori_loop, and >1 batch tile.
    dims = [48, 160, 96, 24]
    batch = 16

    key = jax.random.PRNGKey(0)
    key, kx = jax.random.split(key)
    x = jax.random.normal(kx, (batch, dims[0]), jnp.float32)

    params = init_params(key, dims)

    out = feed_forward_linear(x, params)
    out = jax.block_until_ready(out)

    ref = _reference(x, params)
    assert out.shape == (batch, dims[-1])
    # Matmul operands are bf16 (f32 accumulate + f32 LayerNorm), so compare against
    # the pure-f32 reference with a correspondingly looser tolerance.
    max_err = float(jnp.max(jnp.abs(out - ref)))
    assert max_err < 5e-2, f"mismatch vs pure-JAX reference: max abs err {max_err}"

    print("KERNEL_OK")
</pallas_src>

<mosaic_0001>
module attributes {stable_mosaic.version = 11 : i64} {
  func.func @_fused_kernel(%arg0: i32, %arg1: memref<3xi32, #tpu.memory_space<smem>>, %arg2: memref<8x128xf32, #tpu.memory_space<vmem>>, %arg3: memref<3x256x256xbf16, #tpu.memory_space<vmem>>, %arg4: memref<3x4x256xf32, #tpu.memory_space<vmem>>, %arg5: memref<8x128xf32, #tpu.memory_space<vmem>>, %arg6: memref<8x256xf32, #tpu.memory_space<vmem>>) attributes {dimension_semantics = [#tpu.dimension_semantics<parallel>], iteration_bounds = array<i64: 2>, scalar_prefetch = 1 : i64, scratch_operands = 1 : i64, tpu.core_type = #tpu.core_type<tc>, window_params = [{transform_indices = @transform_0, window_bounds = array<i64: 8, 128>}, {pipeline_mode = #tpu.pipeline_mode<synchronous>, transform_indices = @transform_1, window_bounds = array<i64: 3, 256, 256>}, {pipeline_mode = #tpu.pipeline_mode<synchronous>, transform_indices = @transform_2, window_bounds = array<i64: 3, 4, 256>}, {transform_indices = @transform_3, window_bounds = array<i64: 8, 128>}]} {
    %c0 = arith.constant 0 : index
    %c0_0 = arith.constant 0 : index
    %0 = vector.load %arg2[%c0, %c0_0] : memref<8x128xf32, #tpu.memory_space<vmem>>, vector<8x128xf32>
    %c0_1 = arith.constant 0 : index
    %c0_2 = arith.constant 0 : index
    %1 = vector.load %arg6[%c0_1, %c0_2] : memref<8x256xf32, #tpu.memory_space<vmem>>, vector<8x128xf32>
    tpu.vector_store %arg6[%c0_1, %c0_2], %0 {strides = array<i32>} : memref<8x256xf32, #tpu.memory_space<vmem>>, vector<8x128xf32>,
    %cst = arith.constant 0.000000e+00 : f32
    %2 = vector.broadcast %cst : f32 to vector<8x128xf32>
    %c0_3 = arith.constant 0 : index
    %c128 = arith.constant 128 : index
    %3 = vector.load %arg6[%c0_3, %c128] : memref<8x256xf32, #tpu.memory_space<vmem>>, vector<8x128xf32>
    tpu.vector_store %arg6[%c0_3, %c128], %2 {strides = array<i32>} : memref<8x256xf32, #tpu.memory_space<vmem>>, vector<8x128xf32>,
    %c0_i32 = arith.constant 0 : i32
    %c3_i32 = arith.constant 3 : i32
    %4 = arith.addi %c0_i32, %c3_i32 : i32
    %c1_i32 = arith.constant 1 : i32
    scf.for %arg7 = %c0_i32 to %4 step %c1_i32  : i32 {
      %c0_9 = arith.constant 0 : index
      %c0_10 = arith.constant 0 : index
      %7 = vector.load %arg6[%c0_9, %c0_10] : memref<8x256xf32, #tpu.memory_space<vmem>>, vector<8x256xf32>
      %8 = arith.index_cast %arg7 : i32 to index
      %c0_11 = arith.constant 0 : index
      %c0_12 = arith.constant 0 : index
      %9 = vector.load %arg3[%8, %c0_11, %c0_12] : memref<3x256x256xbf16, #tpu.memory_space<vmem>>, vector<1x256x256xbf16>
      %10 = vector.shape_cast %9 : vector<1x256x256xbf16> to vector<256x256xbf16>
      %11 = arith.index_cast %arg7 : i32 to index
      %c0_13 = arith.constant 0 : index
      %c0_14 = arith.constant 0 : index
      %12 = vector.load %arg4[%11, %c0_13, %c0_14] : memref<3x4x256xf32, #tpu.memory_space<vmem>>, vector<1x4x256xf32>
      %13 = vector.shape_cast %12 : vector<1x4x256xf32> to vector<4x256xf32>
      %14 = vector.extract_strided_slice %13 {offsets = [0, 0], sizes = [1, 256], strides = [1, 1]} : vector<4x256xf32> to vector<1x256xf32>
      %15 = vector.extract_strided_slice %13 {offsets = [1, 0], sizes = [1, 256], strides = [1, 1]} : vector<4x256xf32> to vector<1x256xf32>
      %16 = vector.extract_strided_slice %13 {offsets = [2, 0], sizes = [1, 256], strides = [1, 1]} : vector<4x256xf32> to vector<1x256xf32>
      %17 = vector.extract_strided_slice %13 {offsets = [3, 0], sizes = [1, 256], strides = [1, 1]} : vector<4x256xf32> to vector<1x256xf32>
      %18 = arith.truncf %7 : vector<8x256xf32> to vector<8x256xbf16>
      %cst_15 = arith.constant dense<0.000000e+00> : vector<8x256xf32>
      %19 = tpu.matmul %18, %10, %cst_15 {dimension_numbers = #tpu.dot_dimension_numbers<[1], [0], [0], [1], [0, 0, 1, 1], [], []>} : vector<8x256xbf16>, vector<256x256xbf16>, vector<8x256xf32> -> vector<8x256xf32>
      %20 = vector.broadcast %14 : vector<1x256xf32> to vector<8x256xf32>
      %21 = arith.addf %19, %20 : vector<8x256xf32>
      %22 = arith.index_cast %arg7 : i32 to index
      %23 = memref.load %arg1[%22] : memref<3xi32, #tpu.memory_space<smem>>
      %24 = arith.sitofp %23 : i32 to f32
      %cst_16 = arith.constant 1.000000e+00 : f32
      %25 = arith.divf %cst_16, %24 : f32
      %cst_17 = arith.constant dense<0.000000e+00> : vector<8xf32>
      %26 = vector.multi_reduction <add>, %21, %cst_17 [1] : vector<8x256xf32> to vector<8xf32>
      %27 = vector.shape_cast %26 : vector<8xf32> to vector<8x1xf32>
      %28 = vector.broadcast %25 : f32 to vector<8x1xf32>
      %29 = arith.mulf %27, %28 : vector<8x1xf32>
      %30 = arith.mulf %21, %21 : vector<8x256xf32>
      %cst_18 = arith.constant dense<0.000000e+00> : vector<8xf32>
      %31 = vector.multi_reduction <add>, %30, %cst_18 [1] : vector<8x256xf32> to vector<8xf32>
      %32 = vector.shape_cast %31 : vector<8xf32> to vector<8x1xf32>
      %33 = vector.broadcast %25 : f32 to vector<8x1xf32>
      %34 = arith.mulf %32, %33 : vector<8x1xf32>
      %35 = arith.mulf %29, %29 : vector<8x1xf32>
      %36 = arith.subf %34, %35 : vector<8x1xf32>
      %cst_19 = arith.constant 0.000000e+00 : f32
      %37 = vector.broadcast %cst_19 : f32 to vector<8x1xf32>
      %38 = arith.maximumf %36, %37 : vector<8x1xf32>
      %39 = vector.broadcast %29 : vector<8x1xf32> to vector<8x256xf32>
      %40 = arith.subf %21, %39 : vector<8x256xf32>
      %cst_20 = arith.constant 9.99999974E-6 : f32
      %41 = vector.broadcast %cst_20 : f32 to vector<8x1xf32>
      %42 = arith.addf %38, %41 : vector<8x1xf32>
      %43 = math.rsqrt %42 : vector<8x1xf32>
      %44 = vector.broadcast %43 : vector<8x1xf32> to vector<8x256xf32>
      %45 = arith.mulf %40, %44 : vector<8x256xf32>
      %46 = vector.broadcast %15 : vector<1x256xf32> to vector<8x256xf32>
      %47 = arith.mulf %45, %46 : vector<8x256xf32>
      %48 = vector.broadcast %16 : vector<1x256xf32> to vector<8x256xf32>
      %49 = arith.addf %47, %48 : vector<8x256xf32>
      %cst_21 = arith.constant 0.000000e+00 : f32
      %50 = vector.broadcast %cst_21 : f32 to vector<8x256xf32>
      %51 = arith.cmpf ogt, %49, %50 : vector<8x256xf32>
      %52 = vector.broadcast %17 : vector<1x256xf32> to vector<8x256xf32>
      %53 = arith.mulf %52, %49 : vector<8x256xf32>
      %54 = arith.select %51, %49, %53 : vector<8x256xi1>, vector<8x256xf32>
      %c0_22 = arith.constant 0 : index
      %c0_23 = arith.constant 0 : index
      %55 = vector.load %arg6[%c0_22, %c0_23] : memref<8x256xf32, #tpu.memory_space<vmem>>, vector<8x256xf32>
      tpu.vector_store %arg6[%c0_22, %c0_23], %54 {strides = array<i32>} : memref<8x256xf32, #tpu.memory_space<vmem>>, vector<8x256xf32>,
    }
    %c3_i32_4 = arith.constant 3 : i32
    %c0_5 = arith.constant 0 : index
    %c0_6 = arith.constant 0 : index
    %5 = vector.load %arg6[%c0_5, %c0_6] : memref<8x256xf32, #tpu.memory_space<vmem>>, vector<8x128xf32>
    %c0_7 = arith.constant 0 : index
    %c0_8 = arith.constant 0 : index
    %6 = vector.load %arg5[%c0_7, %c0_8] : memref<8x128xf32, #tpu.memory_space<vmem>>, vector<8x128xf32>
    tpu.vector_store %arg5[%c0_7, %c0_8], %5 {strides = array<i32>} : memref<8x128xf32, #tpu.memory_space<vmem>>, vector<8x128xf32>,
    return
  }
  func.func @transform_0(%arg0: i32, %arg1: memref<3xi32, #tpu.memory_space<smem>>) -> (i32, i32) {
    %c0_i32 = arith.constant 0 : i32
    %c0_i32_0 = arith.constant 0 : i32
    return %arg0, %c0_i32 : i32, i32
  }
  func.func @transform_1(%arg0: i32, %arg1: memref<3xi32, #tpu.memory_space<smem>>) -> (i32, i32, i32) {
    %c0_i32 = arith.constant 0 : i32
    %c0_i32_0 = arith.constant 0 : i32
    %c0_i32_1 = arith.constant 0 : i32
    %c0_i32_2 = arith.constant 0 : i32
    return %c0_i32, %c0_i32_0, %c0_i32_1 : i32, i32, i32
  }
  func.func @transform_2(%arg0: i32, %arg1: memref<3xi32, #tpu.memory_space<smem>>) -> (i32, i32, i32) {
    %c0_i32 = arith.constant 0 : i32
    %c0_i32_0 = arith.constant 0 : i32
    %c0_i32_1 = arith.constant 0 : i32
    %c0_i32_2 = arith.constant 0 : i32
    return %c0_i32, %c0_i32_0, %c0_i32_1 : i32, i32, i32
  }
  func.func @transform_3(%arg0: i32, %arg1: memref<3xi32, #tpu.memory_space<smem>>) -> (i32, i32) {
    %c0_i32 = arith.constant 0 : i32
    %c0_i32_0 = arith.constant 0 : i32
    return %arg0, %c0_i32 : i32, i32
  }
}

</mosaic_0001>

<bundles_post_ra>
// kernel: tpu_custom_call.1
= control target key start
LH: loop header
LB: loop body
LE: loop exit
PB: predicated region body
PF: predicated region fallthrough
CT: control target
= control target key end

     0   :  { %s1145_s18 = smov [#allocation4]   ;;  %s1415_s0 = inlined_call_operand.hbm [shape: s32[3], index: 0, kind: input, shape index: {}]   ;;  %s1416_s1 = inlined_call_operand.hbm [shape: f32[16,128], index: 1, kind: input, shape index: {}]   ;;  %s1417_s2 = inlined_call_operand.hbm [shape: bf16[3,256,256], index: 2, kind: input, shape index: {}]   ;;  %s1418_s3 = inlined_call_operand.hbm [shape: f32[3,4,256], index: 3, kind: input, shape index: {}]   ;;  %s1419_s4 = inlined_call_operand.hbm [shape: f32[16,128], index: 4, kind: output, shape index: {}]  }
   0x1   :  { %s10_s17 = sshll.u32 %s1415_s0, 4  ;;  %s11_s17 = int_to_ptr.hbm [resolvable:$true] %s10_s17 }
   0x2   :  { %13 = dma.hbm_to_smem %s11_s17, 16, %s1145_s18, [#allocation3] }
   0x3   :  { %1111 = dma.done.wait [#allocation3], 16 }
   0x4   :  { %1112 = vsyncadd [#allocation3], 4294967280 }
   0x5   :  { %16 = sfence }
   0x6   :  { %17 = vsyncpa [#allocation6], 0 }
   0x7   :  { %19 = vsyncpa [#allocation6 + $0x1], 0 }
   0x8   :  { %20 = vsyncpa [#allocation9], 0 }
   0x9   :  { %21 = vsyncpa [#allocation7], 0 }
   0xa   :  { %23 = vsyncpa [#allocation7 + $0x1], 0  ;;  %s1179_s19 = smov 0   ;;  %s1181_s20 = smov 0  }
   0xb   :  { %s1183_s21 = smov 0   ;;  %s1185_s22 = smov 0  }
   0xc LB: > { %s139_s24 = sshll.u32 %s1417_s2, 4  ;;  %s1203_s25 = sadd.s32 4294967295, %s1139_s22   ;;  %s1139_s22 = sphi %s1185_s22, %s1430_s22   ;;  %s1135_s21 = sphi %s1183_s21, %s1429_s21   ;;  %s1131_s20 = sphi %s1181_s20, %s1428_s20   ;;  %s1127_s19 = sphi %s1179_s19, %s1427_s19   ;;  %s140_s24 = int_to_ptr.hbm [resolvable:$true] %s139_s24 }
   0xd   : > { %p695_p0 = scmp.ge.s32.totalorder %s1139_s22, 1  ;;  %p50_p1 = scmp.eq.s32.totalorder %s1203_s25, 0 }
   0xe   : > { %p128_p2 = scmp.lt.s32.totalorder %s1139_s22, 3  ;;  %s1146_s27 = smov [#allocation8]  }
   0xf   : > { %s141_s28 = sshll.u32 %s1146_s27, 4  ;;  %s153_s5 = sshll.u32 %s1418_s3, 4  ;;  %s142_s28 = int_to_ptr.vmem [resolvable:$true] %s141_s28  ;;  %s154_s5 = int_to_ptr.hbm [resolvable:$true] %s153_s5 }
  0x10   : > { %p1208_p3 = pnand %p695_p0, %p128_p2  ;;  %s1147_s6 = smov [#allocation10]  }
  0x11   : > { %s155_s7 = sshll.u32 %s1147_s6, 4  ;;  %s1148_s8 = smov 128   ;;  %s156_s7 = int_to_ptr.vmem [resolvable:$true] %s155_s7 }
  0x12   : > { %p890_p4 = pneg %p1208_p3  ;;  %s1149_s9 = smov 8  }
  0x13   : > { %s694_s10 = sadd.s32 4294967294, %s1139_s22   ;;  %s1222_s11 = sadd.s32 1, %s1139_s22  }
  0x14   : > { %p891_p6 = pnand %p890_p4, %p50_p1  ;;  %s33_s12 = ssub.s32 %s1139_s22, %s1222_s11 }
  0x15   : > { %s36_s13 = sadd.s32 1, %s1135_s21  ;;  %p34_p7 = scmp.eq.s32.totalorder %s33_s12, 0 }
  0x16   : > { %893 = dma.hbm_to_vmem [thread:$0]  (!%p891_p6), %s140_s24, 12288, %s142_s28, [#allocation9], %s1148_s8, %s1148_s8, %s1149_s9  }
  0x17   : > { %896 = dma.hbm_to_vmem [thread:$0]  (!%p891_p6), %s154_s5, 384, %s156_s7, [#allocation9], %s1148_s8, %s1148_s8, %s1149_s9  }
  0x18   : > { %p43_p8 = scmp.ne.s32.totalorder %s1135_s21, %s1131_s20  ;;  %p44_p9 = scmp.eq.s32.totalorder %s1139_s22, 0 }
  0x19   : > { %p49_p10 = scmp.ne.s32.totalorder %s1131_s20, %s1127_s19  ;;  %p115_p13 = scmp.eq.s32.totalorder %s1203_s25, 1 }
  0x1a   : > { %s1233_s14 = scalar_select %p34_p7, %s1135_s21, %s36_s13  }
  0x1b   : > { %p1235_p11 = por %p44_p9, %p43_p8  ;;  %p1241_p12 = por %p50_p1, %p49_p10 }
  0x1c   : > { %p121_p0 = scmp.eq.s32.totalorder %s694_s10, 1  ;;  %p907_p2 = scmp.lt.s32.totalorder %s1139_s22, 2 }
  0x1d   : > { %s169_s17 = sand.u32 1, %s1135_s21   ;;  %p1248_p4 = por %p115_p13, %p43_p8 }
  0x1e   : > { %p1252_p6 = por %p121_p0, %p49_p10  ;;  %s699_s23 = sshll.u32 %s169_s17, 3 }
  0x1f   : > { %s700_s24 = sshll.u32 %s1139_s22, 3  ;;  %s173_s30 = scalar_lea.vmem [#allocation5], %s699_s23 }
  0x20   : > { %s177_s29 = scalar_lea.hbm %s1416_s1, %s700_s24  ;;  %s181_s5 = sshll.u32 %s173_s30, 4  ;;  %s182_s5 = int_to_ptr.vmem [resolvable:$true] %s181_s5 }
  0x21   : > { %s179_s6 = sshll.u32 %s177_s29, 4  ;;  %p1262_p7 = pnand %p907_p2, %p1235_p11  ;;  %s180_s6 = int_to_ptr.hbm [resolvable:$true] %s179_s6 }
  0x22   : > { %s170_s8 = scalar_lea.sflag [#allocation6], %s169_s17  ;;  %s1033_s9 = sshra.s32 %s180_s6, 4  ;;  %s1034_s9 = int_to_ptr.hbm [resolvable:$true] %s1033_s9 }
  0x23   : > { %s1035_s10 = scalar_lea.hbm %s1034_s9, 8  ;;  %p1037_p9 = pneg %p1262_p7 }
  0x24   : > { %p1036_p8 = scmp.ne.s32.totalorder %s1034_s9, %s1035_s10  ;;  %s1040_s23 = scalar_lea.hbm %s1416_s1, 16 }
  0x25   : > { %p1041_p11 = scmp.lt.s32.totalorder %s1034_s9, %s1416_s1  ;;  %p1042_p0 = scmp.lt.s32.totalorder %s1040_s23, %s1035_s10 }
  0x26   : > { %p1038_p10 = pnand %p1037_p9, %p1036_p8 }
  0x27   : > { %p1043_p2 = por %p1042_p0, %p1041_p11 }
  0x28   : > { %p1039_p13 = pneg %p1038_p10 }
  0x2a   : > { %p1044_p5 = pnand %p1043_p2, %p1039_p13 }
  0x2c   : > { %1047 = shalt.err (!%p1044_p5)
}
  0x2d   : > { %900 = dma.hbm_to_vmem [thread:$0]  (!%p1262_p7), %s180_s6, 128, %s182_s5, %s170_s8  }
  0x2e   : > { %190 = sbr.rel (%p1208_p3) target bundleno = 402 (0x192), region = 32  ;;  %s1279_s17 = sand.u32 (!%p1208_p3), 1, %s1131_s20  }
  0x2f   : > { %s702_s27 = sshll.u32 (!%p1208_p3), %s1279_s17, 3  ;;  %s193_s28 = scalar_lea.sflag (!%p1208_p3), [#allocation6], %s1279_s17 }
  0x30   : > { %s196_s29 = scalar_lea.vmem (!%p1208_p3), [#allocation5], %s702_s27 }
  0x33   : > { %1114 = dma.done.wait (%p1241_p12), %s193_s28, 128  }
  0x34   : > { %1116 = vsyncadd (%p1241_p12), %s193_s28, 4294967168 }
  0x35   : > { %1118 = dma.done.wait (%p50_p1), [#allocation9], 12672  }
  0x36   : > { %1120 = vsyncadd (%p50_p1), [#allocation9], 4294954624  ;;  %v1150_v0 = vmov 0.0   ;;  %v230_v1 = vld [vmem:[%s196_s29] sm:$0xff]  ;;  %s1291_s26 = scalar_lea.vmem [#allocation11], %s702_s27  ;;  %s1293_s30 = smov 0  }
  0x37   : > { %232 = vst [vmem:[#allocation2 + $0x8] sm:$0xff] %v1150_v0 }
  0x38   : > { %231 = vst [vmem:[#allocation2] sm:$0xff] %v230_v1 }
  0x39 LB: >> { %s842_s16 = sshll.u32 %s1143_s30, 8  ;;  %s501_s6 = sld [smem:[#allocation4 + %s1143_s30]]  ;;  %s1143_s30 = sphi %s1293_s30, %s238_s30  }
  0x3a   : >> { %s1299_s5 = scalar_lea.vmem [#allocation8], %s842_s16  ;;  %s875_s7 = sshll.u32 %s1143_s30, 3 }
  0x3b   : >> { %v768_v2 = vld [vmem:[%s1299_s5 + $0x70] sm:$0xf]  ;;  %v858_v3 = vld [vmem:[%s1299_s5 + $0x74] sm:$0xf0]  ;;  %v857_v7 = vld [vmem:[%s1299_s5 + $0x74] sm:$0xf] }
  0x3c   : >> { %v832_v4 = vld [vmem:[%s1299_s5 + $0xf0] sm:$0xf]  ;;  %v769_v5 = vor.u32 %v858_v3, %v768_v2  ;;  %v874_v6 = vld [vmem:[%s1299_s5 + $0xf4] sm:$0xf0]  ;;  %v770_v8 = vld [vmem:[%s1299_s5 + $0x78] sm:$0xf0] }
  0x3d   : >> { %v833_v9 = vor.u32 %v874_v6, %v832_v4  ;;  %v773_v10 = vor.u32 %v857_v7, %v770_v8  ;;  %v873_v11 = vld [vmem:[%s1299_s5 + $0xf4] sm:$0xf]  ;;  %v834_v12 = vld [vmem:[%s1299_s5 + $0xf8] sm:$0xf0]  ;;  %v760_v13 = vld [vmem:[%s1299_s5 + $0x60] sm:$0xf] }
  0x3e   : >> { %449 = vmatpush.bf16.msra.mxu0 %v769_v5  ;;  %v837_v14 = vor.u32 %v873_v11, %v834_v12  ;;  %v856_v15 = vld [vmem:[%s1299_s5 + $0x64] sm:$0xf0]  ;;  %v824_v16 = vld [vmem:[%s1299_s5 + $0xe0] sm:$0xf]  ;;  %v855_v20 = vld [vmem:[%s1299_s5 + $0x64] sm:$0xf] }
  0x3f   : >> { %v872_v17 = vld [vmem:[%s1299_s5 + $0xe4] sm:$0xf0]  ;;  %462 = vmatpush.bf16.msra.mxu1 %v833_v9  ;;  %475 = vmatpush.bf16.msra.mxu2 %v773_v10  ;;  %v761_v18 = vor.u32 %v856_v15, %v760_v13  ;;  %v762_v21 = vld [vmem:[%s1299_s5 + $0x68] sm:$0xf0]  ;;  %v871_v22 = vld [vmem:[%s1299_s5 + $0xe4] sm:$0xf]  ;;  %s502_s8 = scvt.s32.f32 %s501_s6 }
  0x40   : >> { %v825_v19 = vor.u32 %v872_v17, %v824_v16  ;;  %488 = vmatpush.bf16.msra.mxu3 %v837_v14  ;;  %v765_v23 = vor.u32 %v855_v20, %v762_v21  ;;  %v826_v24 = vld [vmem:[%s1299_s5 + $0xe8] sm:$0xf0]  ;;  %v752_v25 = vld [vmem:[%s1299_s5 + $0x50] sm:$0xf]  ;;  %v854_v26 = vld [vmem:[%s1299_s5 + $0x54] sm:$0xf0] }
  0x41   : >> { %v829_v27 = vor.u32 %v871_v22, %v826_v24  ;;  %v816_v28 = vld [vmem:[%s1299_s5 + $0xd0] sm:$0xf]  ;;  %v870_v29 = vld [vmem:[%s1299_s5 + $0xd4] sm:$0xf0]  ;;  %v853_v30 = vld [vmem:[%s1299_s5 + $0x54] sm:$0xf]  ;;  %v753_v31 = vor.u32 %v854_v26, %v752_v25 }
  0x42   : >> { %450 = vmatpush.bf16.msra.mxu0 %v761_v18  ;;  %v754_v32 = vld [vmem:[%s1299_s5 + $0x58] sm:$0xf0]  ;;  %v869_v33 = vld [vmem:[%s1299_s5 + $0xd4] sm:$0xf]  ;;  %v817_v35 = vor.u32 %v870_v29, %v816_v28  ;;  %v744_v37 = vld [vmem:[%s1299_s5 + $0x40] sm:$0xf] }
  0x43   : >> { %v818_v34 = vld [vmem:[%s1299_s5 + $0xd8] sm:$0xf0]  ;;  %463 = vmatpush.bf16.msra.mxu1 %v825_v19  ;;  %476 = vmatpush.bf16.msra.mxu2 %v765_v23  ;;  %v757_v36 = vor.u32 %v853_v30, %v754_v32  ;;  %v852_v38 = vld [vmem:[%s1299_s5 + $0x44] sm:$0xf0]  ;;  %v808_v39 = vld [vmem:[%s1299_s5 + $0xc0] sm:$0xf] }
  0x44   : >> { %489 = vmatpush.bf16.msra.mxu3 %v829_v27  ;;  %v821_v40 = vor.u32 %v869_v33, %v818_v34  ;;  %v868_v41 = vld [vmem:[%s1299_s5 + $0xc4] sm:$0xf0]  ;;  %v851_v42 = vld [vmem:[%s1299_s5 + $0x44] sm:$0xf]  ;;  %v746_v43 = vld [vmem:[%s1299_s5 + $0x48] sm:$0xf0]  ;;  %v745_v46 = vor.u32 %v852_v38, %v744_v37  ;;  %v503_v38 = vstv %s502_s8 }
  0x45   : >> { %v867_v44 = vld [vmem:[%s1299_s5 + $0xc4] sm:$0xf]  ;;  %v810_v45 = vld [vmem:[%s1299_s5 + $0xc8] sm:$0xf0]  ;;  %v809_v47 = vor.u32 %v868_v41, %v808_v39  ;;  %v749_v48 = vor.u32 %v851_v42, %v746_v43  ;;  %v736_v49 = vld [vmem:[%s1299_s5 + $0x30] sm:$0xf]  ;;  %957 = vrcp.f32 %v503_v38  ;;  %vm509_vm0 = vweird.f32 %v503_v38 }
  0x46   : >> { %451 = vmatpush.bf16.msra.mxu0 %v753_v31  ;;  %v850_v50 = vld [vmem:[%s1299_s5 + $0x34] sm:$0xf0]  ;;  %v800_v51 = vld [vmem:[%s1299_s5 + $0xb0] sm:$0xf]  ;;  %v813_v52 = vor.u32 %v867_v44, %v810_v45  ;;  %v849_v54 = vld [vmem:[%s1299_s5 + $0x34] sm:$0xf] }
  0x47   : >> { %464 = vmatpush.bf16.msra.mxu1 %v817_v35  ;;  %477 = vmatpush.bf16.msra.mxu2 %v757_v36  ;;  %v866_v53 = vld [vmem:[%s1299_s5 + $0xb4] sm:$0xf0]  ;;  %v738_v55 = vld [vmem:[%s1299_s5 + $0x38] sm:$0xf0]  ;;  %v865_v56 = vld [vmem:[%s1299_s5 + $0xb4] sm:$0xf]  ;;  %v737_v58 = vor.u32 %v850_v50, %v736_v49 }
  0x48   : >> { %490 = vmatpush.bf16.msra.mxu3 %v821_v40  ;;  %v802_v57 = vld [vmem:[%s1299_s5 + $0xb8] sm:$0xf0]  ;;  %v801_v59 = vor.u32 %v866_v53, %v800_v51  ;;  %v741_v60 = vor.u32 %v849_v54, %v738_v55  ;;  %v728_v61 = vld [vmem:[%s1299_s5 + $0x20] sm:$0xf]  ;;  %v848_v62 = vld [vmem:[%s1299_s5 + $0x24] sm:$0xf0] }
  0x49   : >> { %v792_v63 = vld [vmem:[%s1299_s5 + $0xa0] sm:$0xf]  ;;  %v805_v0 = vor.u32 %v865_v56, %v802_v57  ;;  %v864_v1 = vld [vmem:[%s1299_s5 + $0xa4] sm:$0xf0]  ;;  %v847_v2 = vld [vmem:[%s1299_s5 + $0x24] sm:$0xf]  ;;  %v729_v6 = vor.u32 %v848_v62, %v728_v61 }
  0x4a   : >> { %452 = vmatpush.bf16.msra.mxu0 %v745_v46  ;;  %v730_v3 = vld [vmem:[%s1299_s5 + $0x28] sm:$0xf0]  ;;  %v863_v4 = vld [vmem:[%s1299_s5 + $0xa4] sm:$0xf]  ;;  %v793_v7 = vor.u32 %v864_v1, %v792_v63  ;;  %v720_v9 = vld [vmem:[%s1299_s5 + $0x10] sm:$0xf] }
  0x4b   : >> { %465 = vmatpush.bf16.msra.mxu1 %v809_v47  ;;  %478 = vmatpush.bf16.msra.mxu2 %v749_v48  ;;  %v794_v5 = vld [vmem:[%s1299_s5 + $0xa8] sm:$0xf0]  ;;  %v733_v8 = vor.u32 %v847_v2, %v730_v3  ;;  %v846_v10 = vld [vmem:[%s1299_s5 + $0x14] sm:$0xf0]  ;;  %v784_v11 = vld [vmem:[%s1299_s5 + $0x90] sm:$0xf]  ;;  %v958_v41 = vpop.eup %957 }
  0x4c   : >> { %491 = vmatpush.bf16.msra.mxu3 %v813_v52  ;;  %v797_v12 = vor.u32 %v863_v4, %v794_v5  ;;  %v862_v13 = vld [vmem:[%s1299_s5 + $0x94] sm:$0xf0]  ;;  %v845_v14 = vld [vmem:[%s1299_s5 + $0x14] sm:$0xf]  ;;  %v722_v15 = vld [vmem:[%s1299_s5 + $0x18] sm:$0xf0]  ;;  %v721_v18 = vor.u32 %v846_v10, %v720_v9  ;;  %v505_v42 = vmul.f32 %v958_v41, %v503_v38  ;;  %vm510_vm1 = vweird.f32 %v958_v41 }
  0x4d   : >> { %v861_v16 = vld [vmem:[%s1299_s5 + $0x94] sm:$0xf]  ;;  %v786_v17 = vld [vmem:[%s1299_s5 + $0x98] sm:$0xf0]  ;;  %v785_v19 = vor.u32 %v862_v13, %v784_v11  ;;  %v725_v20 = vor.u32 %v845_v14, %v722_v15  ;;  %v712_v21 = vld [vmem:[%s1299_s5] sm:$0xf] }
  0x4e   : >> { %453 = vmatpush.bf16.msra.mxu0 %v737_v58  ;;  %v844_v22 = vld [vmem:[%s1299_s5 + $0x4] sm:$0xf0]  ;;  %v776_v23 = vld [vmem:[%s1299_s5 + $0x80] sm:$0xf]  ;;  %v789_v24 = vor.u32 %v861_v16, %v786_v17  ;;  %v843_v26 = vld [vmem:[%s1299_s5 + $0x4] sm:$0xf] }
  0x4f   : >> { %466 = vmatpush.bf16.msra.mxu1 %v801_v59  ;;  %479 = vmatpush.bf16.msra.mxu2 %v741_v60  ;;  %v860_v25 = vld [vmem:[%s1299_s5 + $0x84] sm:$0xf0]  ;;  %v714_v27 = vld [vmem:[%s1299_s5 + $0x8] sm:$0xf0]  ;;  %v859_v28 = vld [vmem:[%s1299_s5 + $0x84] sm:$0xf]  ;;  %v713_v30 = vor.u32 %v844_v22, %v712_v21 }
  0x50   : >> { %492 = vmatpush.bf16.msra.mxu3 %v805_v0  ;;  %v778_v29 = vld [vmem:[%s1299_s5 + $0x88] sm:$0xf0]  ;;  %v239_v31 = vld [vmem:[#allocation2] sm:$0xff]  ;;  %v777_v32 = vor.u32 %v860_v25, %v776_v23  ;;  %v717_v33 = vor.u32 %v843_v26, %v714_v27  ;;  %s278_s9 = scalar_lea.vmem [#allocation10], %s875_s7  ;;  %v515_v45 = vand.u32 2147483648, %v503_v38  ;;  %v506_v47 = vsub.f32 1.0, %v505_v42  ;;  %vm511_vm2 = vmor %vm509_vm0, %vm510_vm1 }
  0x51   : >> { %v240_v34 = vld [vmem:[#allocation2 + $0x8] sm:$0xff]  ;;  %v781_v35 = vor.u32 %v859_v28, %v778_v29  ;;  %v280_v36 = vpack.c.bf16 %v239_v31, %v239_v31  ;;  %v1367_v39 = vld [vmem:[%s278_s9] sm:$0xff]  ;;  %v513_v48 = vand.u32 2147483647, %v503_v38  ;;  %s238_s30 = sadd.s32 1, %s1143_s30  }
  0x52   : >> { %454 = vmatpush.bf16.msra.mxu0 %v729_v6  ;;  %v281_v37 = vpack.c.bf16 %v240_v34, %v240_v34  ;;  %v283_v40 = vperm.slane %v1367_v39, 0  ;;  %v284_v44 = vperm.slane %v1367_v39, 4  ;;  %v507_v50 = vmul.f32 %v958_v41, %v506_v47  ;;  %p235_p1 = scmp.ge.s32.totalorder %s238_s30, 3  }
  0x53   : >> { %467 = vmatpush.bf16.msra.mxu1 %v793_v7  ;;  %480 = vmatpush.bf16.msra.mxu2 %v733_v8  ;;  %v516_v51 = vor.u32 1.1754944e-38, %v515_v45  ;;  %vm514_vm3 = vcmp.eq.f32.partialorder %v513_v48, 8.507059e+37  ;;  %v556_v22 = vperm.slane %v1367_v39, 2  ;;  %v557_v23 = vperm.slane %v1367_v39, 6  ;;  %s839_s12 = sshll.u32 (%p235_p1), %s1203_s25, 3  ;;  %s593_s15 = sshll.u32 (%p235_p1), %s1291_s26, 4  ;;  %s594_s15 = int_to_ptr.vmem [resolvable:$true] %s593_s15 }
  0x54   : >> { %493 = vmatpush.bf16.msra.mxu3 %v797_v12  ;;  %v287_v43 = vperm.slane %v283_v40, 0  ;;  %v288_v53 = vperm.slane %v284_v44, 0  ;;  %v508_v54 = vadd.f32 %v958_v41, %v507_v50  ;;  %v567_v25 = vperm.slane %v1367_v39, 7  ;;  %s591_s24 = scalar_lea.hbm (%p235_p1), %s1419_s4, %s839_s12  ;;  %s581_s28 = scalar_lea.sflag (%p235_p1), [#allocation7], %s1279_s17 }
  0x55   : > { %s595_s27 = sshll.u32 (%p235_p1), %s591_s24, 4  ;;  %s1083_s25 = scalar_lea.hbm (%p235_p1), %s1419_s4, 16  ;;  %s596_s27 = int_to_ptr.hbm [resolvable:$true] %s595_s27 }
  0x56   : >> { %455 = vmatpush.bf16.msra.mxu0 %v721_v18  ;;  %v512_v55 = vsel %vm511_vm2, %v958_v41, %v508_v54  ;;  %s1077_s29 = sshra.s32 (%p235_p1), %s596_s27, 4  ;;  %s1078_s29 = int_to_ptr.hbm [resolvable:$true] %s1077_s29 }
  0x57   : >> { %468 = vmatpush.bf16.msra.mxu1 %v785_v19  ;;  %481 = vmatpush.bf16.msra.mxu2 %v725_v20  ;;  %v517_v57 = vsel %vm514_vm3, %v516_v51, %v512_v55  ;;  %v548_v19 = vperm.slane %v1367_v39, 1  ;;  %v549_v20 = vperm.slane %v1367_v39, 5  ;;  %s1079_s30 = scalar_lea.hbm (%p235_p1), %s1078_s29, 8  ;;  %p1084_p7 = scmp.lt.s32.totalorder (%p235_p1), %s1078_s29, %s1419_s4 }
  0x58   : >> { %494 = vmatpush.bf16.msra.mxu3 %v789_v24  ;;  %876 = vpush %v517_v57  ;;  %v566_v24 = vperm.slane %v1367_v39, 3  ;;  %p1080_p3 = scmp.ne.s32.totalorder (%p235_p1), %s1078_s29, %s1079_s30  ;;  %p1085_p8 = scmp.lt.s32.totalorder (%p235_p1), %s1083_s25, %s1079_s30 }
  0x59   : >> { %v552_v29 = vperm.slane %v548_v19, 1 }
  0x5a   : >> { %456 = vmatpush.bf16.msra.mxu0 %v713_v30  ;;  %v553_v30 = vperm.slane %v549_v20, 1  ;;  %p1081_p5 = pnand (%p235_p1), %p1080_p3, %p1248_p4  ;;  %p1086_p9 = por (%p235_p1), %p1085_p8, %p1084_p7 }
  0x5b   : >> { %469 = vmatpush.bf16.msra.mxu1 %v777_v32  ;;  %482 = vmatpush.bf16.msra.mxu2 %v717_v33  ;;  %v560_v32 = vperm.slane %v556_v22, 2  ;;  %v561_v33 = vperm.slane %v557_v23, 2 }
  0x5c   : >> { %495 = vmatpush.bf16.msra.mxu3 %v781_v35  ;;  %p1082_p12 = pneg (%p235_p1), %p1081_p5 }
  0x5d   : >> { %457 = vmatmul.bf16.vlgmr.msra.gmra.mxu0 %v280_v36 }
  0x5e   : >> { %470 = vmatmul.bf16.vlgmr.msra.gmra.mxu1 %v281_v37  ;;  %483 = vmatmul.bf16.vlgmr.msra.gmra.mxu2 %v280_v36  ;;  %v570_v36 = vperm.slane %v566_v24, 3  ;;  %p1087_p10 = pnand (%p235_p1), %p1086_p9, %p1082_p12 }
  0x5f   : >> { %496 = vmatmul.bf16.vlgmr.msra.gmra.mxu3 %v281_v37  ;;  %v571_v37 = vperm.slane %v567_v25, 3 }
  0x89   : >> { %s877_s10 = spop %876 }
  0x8a   : >> { %v522_v7 = vstv %s877_s10 }
  0xda   : >> { %v458_v46 = vpop.f32.mrf.mxu0 }
  0xdb   : >> { %v471_v49 = vpop.f32.mrf.mxu1  ;;  %v459_v52 = vadd.f32 %v458_v46, %v287_v43 }
  0xdd   : >> { %v472_v58 = vadd.f32 %v471_v49, %v459_v52 }
  0xdf   : >> { %v524_v3 = vmul.f32 %v472_v58, %v472_v58 }
  0xe1   : >> { %v484_v56 = vpop.f32.mrf.mxu2 }
  0xe2   : >> { %v485_v59 = vadd.f32 %v484_v56, %v288_v53  ;;  %v497_v60 = vpop.f32.mrf.mxu3  ;;  %v460_v61 = vpop.f32.mrf.mxu0 }
  0xe3   : >> { %v473_v62 = vpop.f32.mrf.mxu1 }
  0xe4   : >> { %v498_v63 = vadd.f32 %v497_v60, %v485_v59 }
  0xe6   : >> { %v519_v0 = vadd.f32 %v498_v63, %v472_v58  ;;  %v525_v4 = vmul.f32 %v498_v63, %v498_v63 }
  0xe8   : >> { %520 = vadd.xlane.f32.xlu0 %v519_v0  ;;  %v526_v5 = vadd.f32 %v525_v4, %v524_v3 }
  0xe9   : >> { %v486_v1 = vpop.f32.mrf.mxu2 }
  0xea   : >> { %v499_v2 = vpop.f32.mrf.mxu3 }
  0xf0   : >> { %527 = vadd.xlane.f32.xlu0 %v526_v5 }
 0x15b   : >> { %v521_v6 = vpop.xlane.xlu0 %520 }
 0x15c   : >> { %v523_v8 = vmul.f32 %v522_v7, %v521_v6 }
 0x15e   : >> { %v530_v10 = vmul.f32 %v523_v8, %v523_v8  ;;  %v533_v27 = vsub.f32 %v472_v58, %v523_v8  ;;  %v534_v28 = vsub.f32 %v498_v63, %v523_v8 }
 0x163   : >> { %v528_v9 = vpop.xlane.xlu0 %527 }
 0x164   : >> { %v529_v11 = vmul.f32 %v528_v9, %v522_v7 }
 0x166   : >> { %v531_v12 = vsub.f32 %v529_v11, %v530_v10 }
 0x168   : >> { %v532_v13 = vmax.f32 %v531_v12, 0.0 }
 0x16a   : >> { %v535_v14 = vadd.f32 1e-05, %v532_v13 }
 0x16c   : >> { %959 = vrsqrt.f32 %v535_v14  ;;  %vm542_vm5 = vweird.f32 %v535_v14 }
 0x172   : >> { %v960_v15 = vpop.eup %959 }
 0x173   : >> { %v537_v16 = vmul.f32 %v960_v15, %v535_v14  ;;  %vm543_vm4 = vweird.f32 %v960_v15 }
 0x174   : >> { %vm544_vm6 = vmor %vm542_vm5, %vm543_vm4 }
 0x175   : >> { %v538_v17 = vmul.f32 %v960_v15, %v537_v16 }
 0x177   : >> { %v539_v18 = vmul.f32 0.5, %v538_v17 }
 0x179   : >> { %v540_v21 = vsub.f32 1.5, %v539_v18 }
 0x17b   : >> { %v541_v26 = vmul.f32 %v960_v15, %v540_v21 }
 0x17d   : >> { %v545_v31 = vsel %vm544_vm6, %v960_v15, %v541_v26 }
 0x17e   : >> { %v546_v34 = vmul.f32 %v545_v31, %v533_v27  ;;  %v547_v35 = vmul.f32 %v545_v31, %v534_v28 }
 0x180   : >> { %v554_v38 = vmul.f32 %v552_v29, %v546_v34  ;;  %v555_v40 = vmul.f32 %v553_v30, %v547_v35 }
 0x182   : >> { %v562_v41 = vadd.f32 %v560_v32, %v554_v38  ;;  %v563_v42 = vadd.f32 %v561_v33, %v555_v40 }
 0x184   : >> { %vm564_vm7 = vcmp.gt.f32.partialorder %v562_v41, 0.0  ;;  %vm565_vm8 = vcmp.gt.f32.partialorder %v563_v42, 0.0  ;;  %v572_v39 = vmul.f32 %v570_v36, %v562_v41  ;;  %v573_v43 = vmul.f32 %v571_v37, %v563_v42  ;;  %237 = sbr.rel (!%p235_p1) target bundleno = 57 (0x39), region = 94 }
 0x186   : >> { %v574_v44 = vsel %vm564_vm7, %v562_v41, %v572_v39  ;;  %v575_v45 = vsel %vm565_vm8, %v563_v42, %v573_v43 }
 0x187   : >> { %576 = vst [vmem:[#allocation2] sm:$0xff] %v574_v44 }
 0x188   : >> { %577 = vst [vmem:[#allocation2 + $0x8] sm:$0xff] %v575_v45 }
 0x18e   : > { %v578_v46 = vld [vmem:[#allocation2] sm:$0xff] }
 0x18f   : > { %579 = vst [vmem:[%s1291_s26] sm:$0xff] %v578_v46 }
 0x190   : > { %1090 = shalt.err (!%p1087_p10)
}
 0x191   : > { %888 = dma.vmem_to_hbm [thread:$0]  (%p1248_p4), %s594_s15, 128, %s596_s27, %s581_s28  }
 0x192 PF: > { %s607_s17 = sand.u32 1, %s1127_s19   ;;  %p1426_p13 = scmp.ge.s32.totalorder %s1139_s22, 2 }
 0x193   : > { %s608_s26 = scalar_lea.sflag [#allocation7], %s607_s17 }
 0x194   : > { %p902_p11 = pnand %p1426_p13, %p1252_p6 }
 0x196   : > { %p903_p0 = pneg %p902_p11 }
 0x198   : > { %1122 = dma.done.wait (%p903_p0), %s608_s26, 128  }
 0x199   : > { %1124 = vsyncadd (%p903_p0), %s608_s26, 4294967168  ;;  %p26_p2 = scmp.ge.s32.totalorder %s1222_s11, 4   ;;  %s1427_s19 = smov %s1131_s20 }
 0x19a   : > { %s1428_s20 = smov %s1135_s21  ;;  %s1429_s21 = smov %s1233_s14 }
 0x19b   : > { %s1430_s22 = smov %s1222_s11  ;;  %28 = sbr.rel (!%p26_p2) target bundleno = 12 (0xc), region = 105 }
 0x1a0   :  { %614 = vsyncpa [#allocation6], 1 }
 0x1a1   :  { %616 = vsyncpa [#allocation6 + $0x1], 1 }
 0x1a2   :  { %617 = vsyncpa [#allocation9], 1 }
 0x1a3   :  { %618 = vsyncpa [#allocation7], 1 }
 0x1a4   :  { %620 = vsyncpa [#allocation7 + $0x1], 1 }

</bundles_post_ra>
